<compile_context>
chip_gen: v6e
topology: v6e:2x2x1
jax: 0.10.0
libtpu: 0.0.40
codegen_flags: <defaults>
</compile_context>

<pallas_src>
import jax
import jax.numpy as jnp
import numpy as np
from jax.experimental import pallas as pl
from jax.experimental.pallas import tpu as pltpu


def upsample_conv_kernel(xpad_ref, wp_ref, bias_ref, o_ref):
    """One (batch, phase_a, phase_b, row_tile) per grid step.

    xpad_ref: (1, H+2, W+2, Cin)  original-resolution input, zero-padded by 1
    wp_ref:   (1, 4, Cin, Cout)   effective 2x2 weights for this phase (k=2*ty+tx)
    bias_ref: (1, Cout)
    o_ref:    (1, TH, W, Cout)    phase-(pa,pb) output rows [t*TH, (t+1)*TH)
    """
    pa = pl.program_id(1)      # output row parity
    pb = pl.program_id(2)      # output col parity
    t = pl.program_id(3)       # row tile index
    _, TH, W, Cout = o_ref.shape
    Cin = xpad_ref.shape[3]

    row0 = t * TH
    # Initialize accumulator with the bias -> no separate full-size bias add.
    acc = jnp.broadcast_to(bias_ref[...].astype(jnp.float32), (TH * W, Cout))

    # 4 effective taps (2x2) instead of 9 (3x3), statically unrolled.
    for ty in range(2):
        for tx in range(2):
            patch = xpad_ref[0,
                             pl.ds(row0 + pa + ty, TH),
                             pl.ds(pb + tx, W),
                             :]                                  # (TH, W, Cin)
            w_k = wp_ref[0, 2 * ty + tx]                         # (Cin, Cout)
            acc = acc + jnp.dot(patch.reshape(TH * W, Cin), w_k,
                                preferred_element_type=jnp.float32)

    o_ref[0] = acc.reshape(TH, W, Cout).astype(o_ref.dtype)


def _pick_tile_h(H):
    """Largest row-tile <= 8 that divides H (M = TH*W >= 128 for typical W)."""
    for th in range(min(8, H), 0, -1):
        if H % th == 0:
            return th
    return H


def _make_phase_weights(w_hwio, Cin, Cout):
    """Fold the nearest-2x upsample into the 3x3 weights -> (4, 4, Cin, Cout).

    First axis: phase 2*pa+pb.  Second axis: effective tap k = 2*ty+tx.
    """
    w = w_hwio.astype(jnp.float32)
    sel = (((0,), (1, 2)),       # a == 0: ty=0 <- {dy=0}, ty=1 <- {dy=1,2}
           ((0, 1), (2,)))       # a == 1: ty=0 <- {dy=0,1}, ty=1 <- {dy=2}
    phase_taps = []
    for pa in range(2):
        for pb in range(2):
            taps = []
            for ty in range(2):
                for tx in range(2):
                    acc = jnp.zeros((Cin, Cout), jnp.float32)
                    for dy in sel[pa][ty]:
                        for dx in sel[pb][tx]:
                            acc = acc + w[dy, dx]
                    taps.append(acc)
            phase_taps.append(jnp.stack(taps))     # (4, Cin, Cout)
    return jnp.stack(phase_taps)                   # (4, 4, Cin, Cout)


def upsample_forward(x_nchw, w_oihw, bias, *, compute_dtype=None):
    """Equivalent of Upsample.forward: nearest 2x upsample then Conv2d(3x3, pad=1).

    compute_dtype: None -> use input dtype for the matmul operands;
                   jnp.bfloat16 -> bf16 operands / f32 accumulation (v6e/v7x fast path).
    """
    N, Cin, H, W = x_nchw.shape
    Cout = w_oihw.shape[0]
    out_dtype = x_nchw.dtype

    # NCHW -> NHWC and pad by 1. This is the ONLY materialized prep (~1.1x the
    # input bytes, vs ~4.4x for materializing the 2x-upsampled padded tensor).
    x = jnp.transpose(x_nchw, (0, 2, 3, 1))
    if compute_dtype is not None:
        x = x.astype(compute_dtype)
    xpad = jnp.pad(x, ((0, 0), (1, 1), (1, 1), (0, 0)))          # (N, H+2, W+2, Cin)

    # OIHW -> HWIO, then fold the upsample into per-phase 2x2 weights.
    w_hwio = jnp.transpose(w_oihw, (2, 3, 1, 0))                 # (3, 3, Cin, Cout)
    wp = _make_phase_weights(w_hwio, Cin, Cout)                  # (4, 4, Cin, Cout)
    wp = wp.astype(compute_dtype if compute_dtype is not None else x_nchw.dtype)

    b2 = bias.reshape(1, Cout).astype(jnp.float32)

    TH = _pick_tile_h(H)
    n_t = H // TH

    # Output is phase-separated: row (n*4 + 2*pa + pb) holds y[n, 2i+pa, 2j+pb].
    out_flat = pl.pallas_call(
        upsample_conv_kernel,
        out_shape=jax.ShapeDtypeStruct((N * 4, H, W, Cout), out_dtype),
        grid=(N, 2, 2, n_t),
        in_specs=[
            # Original-resolution padded image: resident per batch (block index
            # ignores the phase / row-tile axes -> DMA'd once per batch).
            pl.BlockSpec((1, H + 2, W + 2, Cin), lambda n, pa, pb, t: (n, 0, 0, 0)),
            # Per-phase effective 2x2 weights.
            pl.BlockSpec((1, 4, Cin, Cout), lambda n, pa, pb, t: (2 * pa + pb, 0, 0, 0)),
            # Bias.
            pl.BlockSpec((1, Cout), lambda n, pa, pb, t: (0, 0)),
        ],
        out_specs=pl.BlockSpec(
            (1, TH, W, Cout),
            lambda n, pa, pb, t: (n * 4 + 2 * pa + pb, t, 0, 0)),
        compiler_params=pltpu.CompilerParams(
            dimension_semantics=("parallel", "parallel", "parallel", "parallel"),
            vmem_limit_bytes=64 * 1024 * 1024),
    )(xpad, wp, b2)

    # Interleave the 4 phases and go back to NCHW in a single transpose+reshape:
    # (N,2,2,H,W,C) -> (N,C,H,2,W,2) -> (N,C,2H,2W).
    out_phases = out_flat.reshape(N, 2, 2, H, W, Cout)
    y = jnp.transpose(out_phases, (0, 5, 3, 1, 4, 2)).reshape(N, Cout, 2 * H, 2 * W)
    return y


def reference_forward(x_nchw, w_oihw, bias):
    """Pure-JAX reference (nearest upsample + conv) for correctness check."""
    x_up = jnp.repeat(jnp.repeat(x_nchw, 2, axis=2), 2, axis=3)
    out = jax.lax.conv_general_dilated(
        x_up, w_oihw, window_strides=(1, 1), padding=((1, 1), (1, 1)),
        dimension_numbers=("NCHW", "OIHW", "NCHW"))
    return out + bias.reshape(1, -1, 1, 1)


if __name__ == "__main__":
    # Module config + small deterministic inputs
    N, Cin, H, W = 2, 4, 16, 16
    Cout = 8

    key = jax.random.PRNGKey(0)
    kx, kw, kb = jax.random.split(key, 3)

    x = jax.random.normal(kx, (N, Cin, H, W), dtype=jnp.float32)

    # Deterministic init mimicking PyTorch Conv2d defaults:
    # weight, bias ~ U(-1/sqrt(fan_in), 1/sqrt(fan_in)), fan_in = Cin * 3 * 3
    fan_in = Cin * 3 * 3
    bound = 1.0 / np.sqrt(fan_in)
    w_oihw = jax.random.uniform(kw, (Cout, Cin, 3, 3), jnp.float32, -bound, bound)
    bias = jax.random.uniform(kb, (Cout,), jnp.float32, -bound, bound)

    ref = jax.block_until_ready(reference_forward(x, w_oihw, bias))

    # f32 path (matches the PyTorch module's default dtype).
    out = jax.block_until_ready(upsample_forward(x, w_oihw, bias))
    assert out.shape == (N, Cout, 2 * H, 2 * W), out.shape
    np.testing.assert_allclose(np.asarray(out), np.asarray(ref), rtol=1e-5, atol=1e-5)

    # bf16-operand / f32-accumulation path (v6e/v7x MXU fast path); looser tol.
    out_bf16 = jax.block_until_ready(
        upsample_forward(x, w_oihw, bias, compute_dtype=jnp.bfloat16))
    np.testing.assert_allclose(np.asarray(out_bf16), np.asarray(ref),
                               rtol=5e-2, atol=5e-2)

    print("KERNEL_OK")
</pallas_src>

<mosaic_0001>
module attributes {stable_mosaic.version = 11 : i64} {
  func.func @upsample_conv_kernel(%arg0: i32, %arg1: i32, %arg2: i32, %arg3: i32, %arg4: memref<1x18x18x4xf32, #tpu.memory_space<vmem>>, %arg5: memref<1x4x4x8xf32, #tpu.memory_space<vmem>>, %arg6: memref<1x8xf32, #tpu.memory_space<vmem>>, %arg7: memref<1x8x16x8xf32, #tpu.memory_space<vmem>>) attributes {dimension_semantics = [#tpu.dimension_semantics<parallel>, #tpu.dimension_semantics<parallel>, #tpu.dimension_semantics<parallel>, #tpu.dimension_semantics<parallel>], iteration_bounds = array<i64: 2, 2, 2, 2>, scalar_prefetch = 0 : i64, scratch_operands = 0 : i64, tpu.core_type = #tpu.core_type<tc>, window_params = [{transform_indices = @transform_0, window_bounds = array<i64: 1, 18, 18, 4>}, {transform_indices = @transform_1, window_bounds = array<i64: 1, 4, 4, 8>}, {pipeline_mode = #tpu.pipeline_mode<synchronous>, transform_indices = @transform_2, window_bounds = array<i64: 1, 8>}, {transform_indices = @transform_3, window_bounds = array<i64: 1, 8, 16, 8>}]} {
    %c8_i32 = arith.constant 8 : i32
    %0 = arith.muli %arg3, %c8_i32 : i32
    %c0 = arith.constant 0 : index
    %c0_0 = arith.constant 0 : index
    %1 = vector.load %arg6[%c0, %c0_0] : memref<1x8xf32, #tpu.memory_space<vmem>>, vector<1x8xf32>
    %2 = vector.shape_cast %1 : vector<1x8xf32> to vector<1x8xf32>
    %3 = vector.broadcast %2 : vector<1x8xf32> to vector<128x8xf32>
    %4 = arith.addi %0, %arg1 : i32
    %c0_i32 = arith.constant 0 : i32
    %5 = arith.addi %4, %c0_i32 : i32
    %c0_i32_1 = arith.constant 0 : i32
    %6 = arith.addi %arg2, %c0_i32_1 : i32
    %c0_2 = arith.constant 0 : index
    %7 = arith.index_cast %5 : i32 to index
    %8 = arith.index_cast %6 : i32 to index
    %c0_3 = arith.constant 0 : index
    %9 = vector.load %arg4[%c0_2, %7, %8, %c0_3] : memref<1x18x18x4xf32, #tpu.memory_space<vmem>>, vector<1x8x16x4xf32>
    %10 = vector.shape_cast %9 : vector<1x8x16x4xf32> to vector<8x16x4xf32>
    %c0_4 = arith.constant 0 : index
    %c0_5 = arith.constant 0 : index
    %c0_6 = arith.constant 0 : index
    %c0_7 = arith.constant 0 : index
    %11 = vector.load %arg5[%c0_4, %c0_5, %c0_6, %c0_7] : memref<1x4x4x8xf32, #tpu.memory_space<vmem>>, vector<1x1x4x8xf32>
    %12 = vector.shape_cast %11 : vector<1x1x4x8xf32> to vector<4x8xf32>
    %13 = vector.shape_cast %10 : vector<8x16x4xf32> to vector<128x4xf32>
    %cst = arith.constant dense<0.000000e+00> : vector<128x8xf32>
    %14 = tpu.matmul %13, %12, %cst {dimension_numbers = #tpu.dot_dimension_numbers<[1], [0], [0], [1], [0, 0, 1, 1], [], []>} : vector<128x4xf32>, vector<4x8xf32>, vector<128x8xf32> -> vector<128x8xf32>
    %15 = arith.addf %3, %14 : vector<128x8xf32>
    %16 = arith.addi %0, %arg1 : i32
    %c0_i32_8 = arith.constant 0 : i32
    %17 = arith.addi %16, %c0_i32_8 : i32
    %c1_i32 = arith.constant 1 : i32
    %18 = arith.addi %arg2, %c1_i32 : i32
    %c0_9 = arith.constant 0 : index
    %19 = arith.index_cast %17 : i32 to index
    %20 = arith.index_cast %18 : i32 to index
    %c0_10 = arith.constant 0 : index
    %21 = vector.load %arg4[%c0_9, %19, %20, %c0_10] : memref<1x18x18x4xf32, #tpu.memory_space<vmem>>, vector<1x8x16x4xf32>
    %22 = vector.shape_cast %21 : vector<1x8x16x4xf32> to vector<8x16x4xf32>
    %c0_11 = arith.constant 0 : index
    %c1 = arith.constant 1 : index
    %c0_12 = arith.constant 0 : index
    %c0_13 = arith.constant 0 : index
    %23 = vector.load %arg5[%c0_11, %c1, %c0_12, %c0_13] : memref<1x4x4x8xf32, #tpu.memory_space<vmem>>, vector<1x1x4x8xf32>
    %24 = vector.shape_cast %23 : vector<1x1x4x8xf32> to vector<4x8xf32>
    %25 = vector.shape_cast %22 : vector<8x16x4xf32> to vector<128x4xf32>
    %cst_14 = arith.constant dense<0.000000e+00> : vector<128x8xf32>
    %26 = tpu.matmul %25, %24, %cst_14 {dimension_numbers = #tpu.dot_dimension_numbers<[1], [0], [0], [1], [0, 0, 1, 1], [], []>} : vector<128x4xf32>, vector<4x8xf32>, vector<128x8xf32> -> vector<128x8xf32>
    %27 = arith.addf %15, %26 : vector<128x8xf32>
    %28 = arith.addi %0, %arg1 : i32
    %c1_i32_15 = arith.constant 1 : i32
    %29 = arith.addi %28, %c1_i32_15 : i32
    %c0_i32_16 = arith.constant 0 : i32
    %30 = arith.addi %arg2, %c0_i32_16 : i32
    %c0_17 = arith.constant 0 : index
    %31 = arith.index_cast %29 : i32 to index
    %32 = arith.index_cast %30 : i32 to index
    %c0_18 = arith.constant 0 : index
    %33 = vector.load %arg4[%c0_17, %31, %32, %c0_18] : memref<1x18x18x4xf32, #tpu.memory_space<vmem>>, vector<1x8x16x4xf32>
    %34 = vector.shape_cast %33 : vector<1x8x16x4xf32> to vector<8x16x4xf32>
    %c0_19 = arith.constant 0 : index
    %c2 = arith.constant 2 : index
    %c0_20 = arith.constant 0 : index
    %c0_21 = arith.constant 0 : index
    %35 = vector.load %arg5[%c0_19, %c2, %c0_20, %c0_21] : memref<1x4x4x8xf32, #tpu.memory_space<vmem>>, vector<1x1x4x8xf32>
    %36 = vector.shape_cast %35 : vector<1x1x4x8xf32> to vector<4x8xf32>
    %37 = vector.shape_cast %34 : vector<8x16x4xf32> to vector<128x4xf32>
    %cst_22 = arith.constant dense<0.000000e+00> : vector<128x8xf32>
    %38 = tpu.matmul %37, %36, %cst_22 {dimension_numbers = #tpu.dot_dimension_numbers<[1], [0], [0], [1], [0, 0, 1, 1], [], []>} : vector<128x4xf32>, vector<4x8xf32>, vector<128x8xf32> -> vector<128x8xf32>
    %39 = arith.addf %27, %38 : vector<128x8xf32>
    %40 = arith.addi %0, %arg1 : i32
    %c1_i32_23 = arith.constant 1 : i32
    %41 = arith.addi %40, %c1_i32_23 : i32
    %c1_i32_24 = arith.constant 1 : i32
    %42 = arith.addi %arg2, %c1_i32_24 : i32
    %c0_25 = arith.constant 0 : index
    %43 = arith.index_cast %41 : i32 to index
    %44 = arith.index_cast %42 : i32 to index
    %c0_26 = arith.constant 0 : index
    %45 = vector.load %arg4[%c0_25, %43, %44, %c0_26] : memref<1x18x18x4xf32, #tpu.memory_space<vmem>>, vector<1x8x16x4xf32>
    %46 = vector.shape_cast %45 : vector<1x8x16x4xf32> to vector<8x16x4xf32>
    %c0_27 = arith.constant 0 : index
    %c3 = arith.constant 3 : index
    %c0_28 = arith.constant 0 : index
    %c0_29 = arith.constant 0 : index
    %47 = vector.load %arg5[%c0_27, %c3, %c0_28, %c0_29] : memref<1x4x4x8xf32, #tpu.memory_space<vmem>>, vector<1x1x4x8xf32>
    %48 = vector.shape_cast %47 : vector<1x1x4x8xf32> to vector<4x8xf32>
    %49 = vector.shape_cast %46 : vector<8x16x4xf32> to vector<128x4xf32>
    %cst_30 = arith.constant dense<0.000000e+00> : vector<128x8xf32>
    %50 = tpu.matmul %49, %48, %cst_30 {dimension_numbers = #tpu.dot_dimension_numbers<[1], [0], [0], [1], [0, 0, 1, 1], [], []>} : vector<128x4xf32>, vector<4x8xf32>, vector<128x8xf32> -> vector<128x8xf32>
    %51 = arith.addf %39, %50 : vector<128x8xf32>
    %52 = vector.shape_cast %51 : vector<128x8xf32> to vector<8x16x8xf32>
    %c0_31 = arith.constant 0 : index
    %c0_32 = arith.constant 0 : index
    %c0_33 = arith.constant 0 : index
    %c0_34 = arith.constant 0 : index
    %53 = vector.load %arg7[%c0_31, %c0_32, %c0_33, %c0_34] : memref<1x8x16x8xf32, #tpu.memory_space<vmem>>, vector<1x8x16x8xf32>
    %54 = vector.shape_cast %53 : vector<1x8x16x8xf32> to vector<8x16x8xf32>
    %55 = vector.shape_cast %52 : vector<8x16x8xf32> to vector<1x8x16x8xf32>
    tpu.vector_store %arg7[%c0_31, %c0_32, %c0_33, %c0_34], %55 {strides = array<i32>} : memref<1x8x16x8xf32, #tpu.memory_space<vmem>>, vector<1x8x16x8xf32>,
    return
  }
  func.func @transform_0(%arg0: i32, %arg1: i32, %arg2: i32, %arg3: i32) -> (i32, i32, i32, i32) {
    %c0_i32 = arith.constant 0 : i32
    %c0_i32_0 = arith.constant 0 : i32
    %c0_i32_1 = arith.constant 0 : i32
    %c0_i32_2 = arith.constant 0 : i32
    return %arg0, %c0_i32, %c0_i32_0, %c0_i32_1 : i32, i32, i32, i32
  }
  func.func @transform_1(%arg0: i32, %arg1: i32, %arg2: i32, %arg3: i32) -> (i32, i32, i32, i32) {
    %c2_i32 = arith.constant 2 : i32
    %0 = arith.muli %c2_i32, %arg1 : i32
    %1 = arith.addi %0, %arg2 : i32
    %c0_i32 = arith.constant 0 : i32
    %c0_i32_0 = arith.constant 0 : i32
    %c0_i32_1 = arith.constant 0 : i32
    %c0_i32_2 = arith.constant 0 : i32
    return %1, %c0_i32, %c0_i32_0, %c0_i32_1 : i32, i32, i32, i32
  }
  func.func @transform_2(%arg0: i32, %arg1: i32, %arg2: i32, %arg3: i32) -> (i32, i32) {
    %c0_i32 = arith.constant 0 : i32
    %c0_i32_0 = arith.constant 0 : i32
    %c0_i32_1 = arith.constant 0 : i32
    return %c0_i32, %c0_i32_0 : i32, i32
  }
  func.func @transform_3(%arg0: i32, %arg1: i32, %arg2: i32, %arg3: i32) -> (i32, i32, i32, i32) {
    %c4_i32 = arith.constant 4 : i32
    %0 = arith.muli %arg0, %c4_i32 : i32
    %c2_i32 = arith.constant 2 : i32
    %1 = arith.muli %c2_i32, %arg1 : i32
    %2 = arith.addi %0, %1 : i32
    %3 = arith.addi %2, %arg2 : i32
    %c0_i32 = arith.constant 0 : i32
    %c0_i32_0 = arith.constant 0 : i32
    %c0_i32_1 = arith.constant 0 : i32
    return %3, %arg3, %c0_i32, %c0_i32_0 : i32, i32, i32, i32
  }
}

</mosaic_0001>

<bundles_post_ra>
// kernel: tpu_custom_call.1
= control target key start
LH: loop header
LB: loop body
LE: loop exit
PB: predicated region body
PF: predicated region fallthrough
CT: control target
= control target key end

     0   :  { %s1857_s12 = smov 0   ;;  %s1859_s13 = smov 0   ;;  %s2180_s0 = inlined_call_operand.vmem [shape: f32[2,18,18,4], index: 0, kind: input, shape index: {}]   ;;  %s2181_s1 = inlined_call_operand.vmem [shape: f32[4,4,4,8], index: 1, kind: input, shape index: {}]   ;;  %s2182_s2 = inlined_call_operand.vmem [shape: f32[1,8], index: 2, kind: input, shape index: {}]   ;;  %s2183_s3 = inlined_call_operand.vmem [shape: f32[8,16,16,8], index: 3, kind: output, shape index: {}]  }
   0x1   :  { %s1861_s14 = smov 0   ;;  %s1863_s15 = smov 0  }
   0x2   :  { %s1865_s16 = smov 0   ;;  %s1867_s17 = smov 0  }
   0x3   :  { %s1869_s18 = smov 0   ;;  %s1871_s19 = smov 0  }
   0x4   :  { %s1873_s20 = smov 0  }
   0x5 LB: > { %s28_s21 = sadd.s32 1, %s1819_s16  ;;  %s31_s22 = sadd.s32 1, %s1823_s17  ;;  %s1835_s20 = sphi %s1873_s20, %s13_s20   ;;  %s1831_s19 = sphi %s1871_s19, %s2191_s19   ;;  %s1827_s18 = sphi %s1869_s18, %s2190_s18   ;;  %s1823_s17 = sphi %s1867_s17, %s2189_s17   ;;  %s1819_s16 = sphi %s1865_s16, %s2188_s16   ;;  %s1815_s15 = sphi %s1863_s15, %s2187_s15   ;;  %s1811_s14 = sphi %s1861_s14, %s2186_s14   ;;  %s1807_s13 = sphi %s1859_s13, %s2185_s13   ;;  %s1803_s12 = sphi %s1857_s12, %s2184_s12  }
   0x6   : > { %p29_p0 = scmp.ge.s32.totalorder %s28_s21, 2  ;;  %p1382_p1 = scmp.ge.s32.totalorder %s1835_s20, 1 }
   0x7   : > { %p191_p2 = scmp.lt.s32.totalorder %s1835_s20, 17  ;;  %s35_s23 = sadd.s32 1, %s1827_s18 }
   0x8   : > { %s2193_s21 = smov (%p29_p0, %s28_s21), 0  ;;  %s2195_s22 = smov (!%p29_p0, %s31_s22), %s1823_s17 }
   0x9   : > { %p33_p3 = scmp.ge.s32.totalorder %s2195_s22, 2  ;;  %p192_p4 = pnand %p1382_p1, %p191_p2 }
   0xa   : > { %s39_s24 = sadd.s32 1, %s1831_s19  ;;  %p231_p7 = scmp.lt.s32.totalorder (!%p192_p4), %s1815_s15, 1 }
   0xb   : > { %s2197_s22 = smov (%p33_p3, %s2195_s22), 0  ;;  %s2199_s23 = smov (!%p33_p3, %s35_s23), %s1827_s18 }
   0xc   : > { %p37_p5 = scmp.ge.s32.totalorder %s2199_s23, 2  ;;  %s1384_s25 = sshll.u32 (!%p192_p4), %s1811_s14, 1 }
   0xd   : > { %195 = sbr.rel (%p192_p4) target bundleno = 291 (0x123), region = 32  ;;  %s237_s26 = sadd.s32 (!%p192_p4), %s1807_s13, %s1384_s25 }
   0xe   : > { %s2201_s23 = smov (%p37_p5, %s2199_s23), 0  ;;  %s2203_s24 = smov (!%p37_p5, %s39_s24), %s1831_s19 }
   0xf   : > { %p41_p6 = scmp.ge.s32.totalorder %s2203_s24, 2  ;;  %s1387_s27 = sshll.u32 (!%p192_p4), %s1815_s15, 2 }
  0x10   : > { %p238_p8 = scmp.lt.s32.totalorder (!%p192_p4), %s237_s26, 3  ;;  %s247_s28 = sadd.s32 (!%p192_p4), %s1387_s27, %s1384_s25 }
  0x11   : > { %s2205_s24 = smov (%p41_p6, %s2203_s24), 0  ;;  %s248_s30 = sadd.s32 (!%p192_p4), %s1807_s13, %s247_s28 }
  0x12   : > { %s2207_s15 = smov (!%p231_p7, %s1815_s15), 1  ;;  %s2209_s26 = smov (!%p238_p8, %s237_s26), 3  ;;  %vm342_vm0 = vcmask 1043456   ;;  %vm293_vm1 = vcmask 31744   ;;  %vm1206_vm2 = vcmask 64512  }
  0x13   : > { %s1692_s29 = smul.u32 432, %s2207_s15  ;;  %s1389_s7 = sshll.u32 %s1803_s12, 3 }
  0x14   : > { %s1519_s8 = sshll.u32 %s2209_s26, 4  ;;  %p250_p9 = scmp.lt.s32.totalorder %s248_s30, 7 }
  0x15   : > { %s235_s6 = scalar_lea.vmem %s2180_s0, %s1692_s29  ;;  %s242_s11 = scalar_lea.vmem %s2181_s1, %s1519_s8 }
  0x16   : > { %p252_p10 = scmp.lt.s32.totalorder %s1389_s7, 15  ;;  %s2211_s30 = smov (!%p250_p9, %s248_s30), 7  ;;  %v292_v0 = vld [vmem:[%s242_s11] sm:$0xf]  ;;  %v1429_v1 = vld [vmem:[%s242_s11 + $0x4] sm:$0xf] }
  0x17   : > { %1588 = vmatprep.subr.msk.mxu0 %vm342_vm0, %v292_v0  ;;  %1614 = vmatprep.subr.msk.mxu1 %vm342_vm0, %v1429_v1  ;;  %v1464_v2 = vld [vmem:[%s242_s11 + $0x8] sm:$0xf]  ;;  %v1499_v3 = vld [vmem:[%s242_s11 + $0xc] sm:$0xf]  ;;  %s1391_s12 = sshll.u32 %s2211_s30, 5  ;;  %s272_s25 = sadd.s32 %s1811_s14, %s1389_s7 }
  0x18   : > { %s253_s15 = scalar_select %p252_p10, %s1389_s7, 15  ;;  %1589 = vmatpush3.msk.msra.mxu0 %vm342_vm0, %v292_v0  ;;  %1615 = vmatpush3.msk.msra.mxu1 %vm342_vm0, %v1429_v1  ;;  %v2065_v0 = vld [vmem:[%s2182_s2] ss:$0 sm:$0xff] }
  0x19   : > { %s273_s27 = smul.u32 24, %s272_s25  ;;  %1640 = vmatprep.subr.msk.mxu0 %vm342_vm0, %v1464_v2  ;;  %1666 = vmatprep.subr.msk.mxu1 %vm342_vm0, %v1499_v3 }
  0x1a   : > { %s1390_s26 = sshll.u32 %s253_s15, 1 }
  0x1b   : > { %s1939_s28 = sadd.s32 %s1391_s12, %s1390_s26  ;;  %s274_s29 = sadd.s32 %s1807_s13, %s273_s27 }
  0x1c   : > { %s1942_s4 = scalar_lea.vmem %s235_s6, %s274_s29  ;;  %s1392_s30 = sshll.u32 %s1939_s28, 3 }
  0x1d   : > { %v276_v4 = vld [vmem:[%s1942_s4] sm:$0xff]  ;;  %v277_v5 = vld [vmem:[%s1942_s4 + $0x8] sm:$0xff]  ;;  %v278_v8 = vld [vmem:[%s1942_s4 + $0x18] sm:$0xff]  ;;  %s2091_s7 = scalar_lea.vmem %s2183_s3, %s1392_s30 }
  0x1e   : > { %v1413_v6 = vld [vmem:[%s1942_s4 + $0x1] sm:$0xff]  ;;  %1590 = vmatprep.mubr.msk.f32.mxu0 %vm293_vm1, %v276_v4  ;;  %v1414_v7 = vld [vmem:[%s1942_s4 + $0x9] sm:$0xff]  ;;  %v1415_v9 = vld [vmem:[%s1942_s4 + $0x19] sm:$0xff] }
  0x1f   : > { %1616 = vmatprep.mubr.msk.f32.mxu1 %vm293_vm1, %v1413_v6  ;;  %1591 = vmatmul.mubr.msk.f32.vlgmr.msra.gmra.mxu0 %vm293_vm1, %v277_v5  ;;  %v279_v10 = vld [vmem:[%s1942_s4 + $0x20] sm:$0xff]  ;;  %v280_v12 = vld [vmem:[%s1942_s4 + $0x30] sm:$0xff]  ;;  %v281_v14 = vld [vmem:[%s1942_s4 + $0x38] sm:$0xff] }
  0x20   : > { %1617 = vmatmul.mubr.msk.f32.vlgmr.msra.gmra.mxu1 %vm293_vm1, %v1414_v7  ;;  %1641 = vmatpush3.msk.msra.mxu0 %vm342_vm0, %v1464_v2  ;;  %v1416_v11 = vld [vmem:[%s1942_s4 + $0x21] sm:$0xff]  ;;  %v1417_v13 = vld [vmem:[%s1942_s4 + $0x31] sm:$0xff]  ;;  %v1418_v15 = vld [vmem:[%s1942_s4 + $0x39] sm:$0xff] }
  0x21   : > { %1593 = vmatprep.mubr.msk.f32.mxu0 %vm293_vm1, %v278_v8  ;;  %1667 = vmatpush3.msk.msra.mxu1 %vm342_vm0, %v1499_v3  ;;  %v282_v16 = vld [vmem:[%s1942_s4 + $0x48] sm:$0xff]  ;;  %v283_v18 = vld [vmem:[%s1942_s4 + $0x50] sm:$0xff]  ;;  %v284_v20 = vld [vmem:[%s1942_s4 + $0x60] sm:$0xff] }
  0x22   : > { %1619 = vmatprep.mubr.msk.f32.mxu1 %vm293_vm1, %v1415_v9  ;;  %v1419_v17 = vld [vmem:[%s1942_s4 + $0x49] sm:$0xff]  ;;  %v1420_v19 = vld [vmem:[%s1942_s4 + $0x51] sm:$0xff]  ;;  %v1421_v21 = vld [vmem:[%s1942_s4 + $0x61] sm:$0xff] }
  0x23   : > { %1594 = vmatmul.mubr.msk.f32.gmra.mxu0 %vm293_vm1, %v279_v10  ;;  %v285_v22 = vld [vmem:[%s1942_s4 + $0x68] sm:$0xff]  ;;  %v286_v24 = vld [vmem:[%s1942_s4 + $0x78] sm:$0xff]  ;;  %v287_v26 = vld [vmem:[%s1942_s4 + $0x80] sm:$0xff] }
  0x24   : > { %1620 = vmatmul.mubr.msk.f32.gmra.mxu1 %vm293_vm1, %v1416_v11  ;;  %1596 = vmatprep.mubr.msk.f32.mxu0 %vm293_vm1, %v280_v12  ;;  %v1422_v23 = vld [vmem:[%s1942_s4 + $0x69] sm:$0xff]  ;;  %v1423_v25 = vld [vmem:[%s1942_s4 + $0x79] sm:$0xff]  ;;  %v1424_v27 = vld [vmem:[%s1942_s4 + $0x81] sm:$0xff] }
  0x25   : > { %1622 = vmatprep.mubr.msk.f32.mxu1 %vm293_vm1, %v1417_v13  ;;  %v288_v28 = vld [vmem:[%s1942_s4 + $0x90] sm:$0xff]  ;;  %v289_v30 = vld [vmem:[%s1942_s4 + $0x98] sm:$0xff]  ;;  %v290_v32 = vld [vmem:[%s1942_s4 + $0xa8] sm:$0xff] }
  0x26   : > { %v1425_v29 = vld [vmem:[%s1942_s4 + $0x91] sm:$0xff]  ;;  %v1426_v31 = vld [vmem:[%s1942_s4 + $0x99] sm:$0xff]  ;;  %v1427_v33 = vld [vmem:[%s1942_s4 + $0xa9] sm:$0xff] }
  0x27   : > { %1597 = vmatmul.mubr.msk.f32.gmra.mxu0 %vm293_vm1, %v281_v14  ;;  %v291_v34 = vld [vmem:[%s1942_s4 + $0xb0] sm:$0xff]  ;;  %v1462_v36 = vld [vmem:[%s1942_s4 + $0xc0] sm:$0xff]  ;;  %v1463_v38 = vld [vmem:[%s1942_s4 + $0xc8] sm:$0xff] }
  0x28   : > { %1623 = vmatmul.mubr.msk.f32.gmra.mxu1 %vm293_vm1, %v1418_v15  ;;  %1599 = vmatprep.mubr.msk.f32.mxu0 %vm293_vm1, %v282_v16  ;;  %v1428_v35 = vld [vmem:[%s1942_s4 + $0xb1] sm:$0xff]  ;;  %v1497_v37 = vld [vmem:[%s1942_s4 + $0xc1] sm:$0xff]  ;;  %v1498_v39 = vld [vmem:[%s1942_s4 + $0xc9] sm:$0xff] }
  0x29   : > { %1625 = vmatprep.mubr.msk.f32.mxu1 %vm293_vm1, %v1419_v17 }
  0x2b   : > { %1600 = vmatmul.mubr.msk.f32.gmra.mxu0 %vm293_vm1, %v283_v18 }
  0x2c   : > { %1626 = vmatmul.mubr.msk.f32.gmra.mxu1 %vm293_vm1, %v1420_v19  ;;  %1602 = vmatprep.mubr.msk.f32.mxu0 %vm293_vm1, %v284_v20 }
  0x2d   : > { %1628 = vmatprep.mubr.msk.f32.mxu1 %vm293_vm1, %v1421_v21 }
  0x2f   : > { %1603 = vmatmul.mubr.msk.f32.gmra.mxu0 %vm293_vm1, %v285_v22 }
  0x30   : > { %1629 = vmatmul.mubr.msk.f32.gmra.mxu1 %vm293_vm1, %v1422_v23  ;;  %1605 = vmatprep.mubr.msk.f32.mxu0 %vm293_vm1, %v286_v24 }
  0x31   : > { %1631 = vmatprep.mubr.msk.f32.mxu1 %vm293_vm1, %v1423_v25 }
  0x33   : > { %1606 = vmatmul.mubr.msk.f32.gmra.mxu0 %vm293_vm1, %v287_v26 }
  0x34   : > { %1632 = vmatmul.mubr.msk.f32.gmra.mxu1 %vm293_vm1, %v1424_v27  ;;  %1608 = vmatprep.mubr.msk.f32.mxu0 %vm293_vm1, %v288_v28 }
  0x35   : > { %1634 = vmatprep.mubr.msk.f32.mxu1 %vm293_vm1, %v1425_v29 }
  0x37   : > { %1609 = vmatmul.mubr.msk.f32.gmra.mxu0 %vm293_vm1, %v289_v30 }
  0x38   : > { %1635 = vmatmul.mubr.msk.f32.gmra.mxu1 %vm293_vm1, %v1426_v31  ;;  %1611 = vmatprep.mubr.msk.f32.mxu0 %vm293_vm1, %v290_v32 }
  0x39   : > { %1637 = vmatprep.mubr.msk.f32.mxu1 %vm293_vm1, %v1427_v33 }
  0x3b   : > { %1612 = vmatmul.mubr.msk.f32.gmra.mxu0 %vm293_vm1, %v291_v34 }
  0x3c   : > { %1638 = vmatmul.mubr.msk.f32.gmra.mxu1 %vm293_vm1, %v1428_v35  ;;  %1642 = vmatprep.mubr.msk.f32.mxu0 %vm293_vm1, %v278_v8 }
  0x3d   : > { %1668 = vmatprep.mubr.msk.f32.mxu1 %vm293_vm1, %v1415_v9 }
  0x3f   : > { %1643 = vmatmul.mubr.msk.f32.vlgmr.msra.gmra.mxu0 %vm293_vm1, %v279_v10 }
  0x40   : > { %1669 = vmatmul.mubr.msk.f32.vlgmr.msra.gmra.mxu1 %vm293_vm1, %v1416_v11  ;;  %1645 = vmatprep.mubr.msk.f32.mxu0 %vm293_vm1, %v280_v12 }
  0x41   : > { %1671 = vmatprep.mubr.msk.f32.mxu1 %vm293_vm1, %v1417_v13 }
  0x43   : > { %1646 = vmatmul.mubr.msk.f32.gmra.mxu0 %vm293_vm1, %v281_v14 }
  0x44   : > { %1672 = vmatmul.mubr.msk.f32.gmra.mxu1 %vm293_vm1, %v1418_v15  ;;  %1648 = vmatprep.mubr.msk.f32.mxu0 %vm293_vm1, %v282_v16 }
  0x45   : > { %1674 = vmatprep.mubr.msk.f32.mxu1 %vm293_vm1, %v1419_v17 }
  0x47   : > { %1649 = vmatmul.mubr.msk.f32.gmra.mxu0 %vm293_vm1, %v283_v18 }
  0x48   : > { %1675 = vmatmul.mubr.msk.f32.gmra.mxu1 %vm293_vm1, %v1420_v19  ;;  %1651 = vmatprep.mubr.msk.f32.mxu0 %vm293_vm1, %v284_v20 }
  0x49   : > { %1677 = vmatprep.mubr.msk.f32.mxu1 %vm293_vm1, %v1421_v21 }
  0x4b   : > { %1652 = vmatmul.mubr.msk.f32.gmra.mxu0 %vm293_vm1, %v285_v22 }
  0x4c   : > { %1678 = vmatmul.mubr.msk.f32.gmra.mxu1 %vm293_vm1, %v1422_v23  ;;  %1654 = vmatprep.mubr.msk.f32.mxu0 %vm293_vm1, %v286_v24 }
  0x4d   : > { %1680 = vmatprep.mubr.msk.f32.mxu1 %vm293_vm1, %v1423_v25 }
  0x4f   : > { %1655 = vmatmul.mubr.msk.f32.gmra.mxu0 %vm293_vm1, %v287_v26 }
  0x50   : > { %1681 = vmatmul.mubr.msk.f32.gmra.mxu1 %vm293_vm1, %v1424_v27  ;;  %1657 = vmatprep.mubr.msk.f32.mxu0 %vm293_vm1, %v288_v28 }
  0x51   : > { %1683 = vmatprep.mubr.msk.f32.mxu1 %vm293_vm1, %v1425_v29 }
  0x53   : > { %1658 = vmatmul.mubr.msk.f32.gmra.mxu0 %vm293_vm1, %v289_v30 }
  0x54   : > { %1684 = vmatmul.mubr.msk.f32.gmra.mxu1 %vm293_vm1, %v1426_v31  ;;  %1660 = vmatprep.mubr.msk.f32.mxu0 %vm293_vm1, %v290_v32 }
  0x55   : > { %1686 = vmatprep.mubr.msk.f32.mxu1 %vm293_vm1, %v1427_v33 }
  0x57   : > { %1661 = vmatmul.mubr.msk.f32.gmra.mxu0 %vm293_vm1, %v291_v34 }
  0x58   : > { %1687 = vmatmul.mubr.msk.f32.gmra.mxu1 %vm293_vm1, %v1428_v35  ;;  %1663 = vmatprep.mubr.msk.f32.mxu0 %vm293_vm1, %v1462_v36 }
  0x59   : > { %1689 = vmatprep.mubr.msk.f32.mxu1 %vm293_vm1, %v1497_v37 }
  0x5b   : > { %1664 = vmatmul.mubr.msk.f32.gmra.mxu0 %vm293_vm1, %v1463_v38 }
  0x5c   : > { %1690 = vmatmul.mubr.msk.f32.gmra.mxu1 %vm293_vm1, %v1498_v39 }
  0xdf   : > { %v1592_v40 = vpop.f32.mrf.mxu0 }
  0xe0   : > { %v1618_v41 = vpop.f32.mrf.mxu1  ;;  %v492_v5 = vadd.f32 %v1592_v40, %v2065_v0 }
  0xe1   : > { %v412_v42 = vpop.f32.mrf.mxu0 }
  0xe2   : > { %v645_v43 = vpop.f32.mrf.mxu1  ;;  %v491_v8 = vadd.f32 %v2065_v0, %v412_v42  ;;  %v725_v11 = vadd.f32 %v1618_v41, %v492_v5 }
  0xe3   : > { %v1595_v44 = vpop.f32.mrf.mxu0 }
  0xe4   : > { %v1621_v45 = vpop.f32.mrf.mxu1  ;;  %v494_v12 = vadd.f32 %v1595_v44, %v2065_v0  ;;  %v724_v15 = vadd.f32 %v645_v43, %v491_v8 }
  0xe5   : > { %v422_v46 = vpop.f32.mrf.mxu0 }
  0xe6   : > { %v655_v47 = vpop.f32.mrf.mxu1  ;;  %v493_v16 = vadd.f32 %v2065_v0, %v422_v46  ;;  %v727_v20 = vadd.f32 %v1621_v45, %v494_v12 }
  0xe7   : > { %v1598_v48 = vpop.f32.mrf.mxu0 }
  0xe8   : > { %v1624_v49 = vpop.f32.mrf.mxu1  ;;  %v496_v21 = vadd.f32 %v1598_v48, %v2065_v0  ;;  %v726_v26 = vadd.f32 %v655_v47, %v493_v16 }
  0xe9   : > { %v432_v50 = vpop.f32.mrf.mxu0 }
  0xea   : > { %v665_v51 = vpop.f32.mrf.mxu1  ;;  %v495_v27 = vadd.f32 %v2065_v0, %v432_v50  ;;  %v729_v32 = vadd.f32 %v1624_v49, %v496_v21 }
  0xeb   : > { %v1601_v52 = vpop.f32.mrf.mxu0 }
  0xec   : > { %v1627_v53 = vpop.f32.mrf.mxu1  ;;  %v498_v33 = vadd.f32 %v1601_v52, %v2065_v0  ;;  %v728_v38 = vadd.f32 %v665_v51, %v495_v27 }
  0xed   : > { %v442_v54 = vpop.f32.mrf.mxu0 }
  0xee   : > { %v2046_v55 = vpop.f32.mrf.mxu1  ;;  %v497_v39 = vadd.f32 %v2065_v0, %v442_v54  ;;  %v731_v44 = vadd.f32 %v1627_v53, %v498_v33 }
  0xef   : > { %v1604_v56 = vpop.f32.mrf.mxu0 }
  0xf0   : > { %v2048_v57 = vpop.f32.mrf.mxu1  ;;  %v500_v45 = vadd.f32 %v1604_v56, %v2065_v0  ;;  %v730_v50 = vadd.f32 %v2046_v55, %v497_v39 }
  0xf1   : > { %v2050_v58 = vpop.f32.mrf.mxu0 }
  0xf2   : > { %v2052_v59 = vpop.f32.mrf.mxu1  ;;  %v499_v51 = vadd.f32 %v2065_v0, %v2050_v58  ;;  %v733_v56 = vadd.f32 %v2048_v57, %v500_v45 }
  0xf3   : > { %v2054_v60 = vpop.f32.mrf.mxu0 }
  0xf4   : > { %v2056_v61 = vpop.f32.mrf.mxu1  ;;  %v502_v8 = vadd.f32 %v2054_v60, %v2065_v0  ;;  %v732_v58 = vadd.f32 %v2052_v59, %v499_v51 }
  0xf5   : > { %v2058_v62 = vpop.f32.mrf.mxu0 }
  0xf6   : > { %v2060_v63 = vpop.f32.mrf.mxu1  ;;  %v735_v60 = vadd.f32 %v2056_v61, %v502_v8 }
  0xf7   : > { %v2067_v1 = vpop.f32.mrf.mxu0 }
  0xf8   : > { %v2069_v2 = vpop.f32.mrf.mxu1 }
  0xf9   : > { %v2071_v3 = vpop.f32.mrf.mxu0 }
  0xfa   : > { %v2073_v4 = vpop.f32.mrf.mxu1 }
  0xfb   : > { %v2076_v6 = vpop.f32.mrf.mxu0 }
  0xfc   : > { %v2078_v7 = vpop.f32.mrf.mxu1 }
  0xfd   : > { %v2081_v9 = vpop.f32.mrf.mxu0 }
  0xfe   : > { %v2083_v10 = vpop.f32.mrf.mxu1 }
  0xff   : > { %v1644_v13 = vpop.f32.mrf.mxu0 }
 0x100   : > { %v1670_v14 = vpop.f32.mrf.mxu1  ;;  %v959_v17 = vadd.f32 %v1644_v13, %v725_v11 }
 0x101   : > { %v879_v18 = vpop.f32.mrf.mxu0 }
 0x102   : > { %v1111_v19 = vpop.f32.mrf.mxu1  ;;  %v1191_v22 = vadd.f32 %v1670_v14, %v959_v17  ;;  %v958_v23 = vadd.f32 %v879_v18, %v724_v15  ;;  %v501_v14 = vadd.f32 %v2065_v0, %v2058_v62  ;;  %v504_v18 = vadd.f32 %v2067_v1, %v2065_v0 }
 0x103   : > { %v1647_v24 = vpop.f32.mrf.mxu0 }
 0x104   : > { %v1673_v25 = vpop.f32.mrf.mxu1  ;;  %1208 = vst.msk [vmem:[%s2091_s7 + $0x8] sm:$0xff] %vm1206_vm2, %v1191_v22  ;;  %v1190_v28 = vadd.f32 %v1111_v19, %v958_v23  ;;  %v961_v29 = vadd.f32 %v1647_v24, %v727_v20  ;;  %v734_v62 = vadd.f32 %v2060_v63, %v501_v14  ;;  %v503_v22 = vadd.f32 %v2065_v0, %v2071_v3 }
 0x105   : > { %v889_v30 = vpop.f32.mrf.mxu0  ;;  %v737_v1 = vadd.f32 %v2069_v2, %v504_v18 }
 0x106   : > { %v1121_v31 = vpop.f32.mrf.mxu1  ;;  %1207 = vst.msk [vmem:[%s2091_s7] sm:$0xff] %vm1206_vm2, %v1190_v28  ;;  %v1193_v34 = vadd.f32 %v1673_v25, %v961_v29  ;;  %v960_v35 = vadd.f32 %v889_v30, %v726_v26  ;;  %v506_v26 = vadd.f32 %v2076_v6, %v2065_v0  ;;  %v736_v3 = vadd.f32 %v2073_v4, %v503_v22 }
 0x107   : > { %v1650_v36 = vpop.f32.mrf.mxu0  ;;  %v505_v30 = vadd.f32 %v2065_v0, %v2081_v9 }
 0x108   : > { %v1676_v37 = vpop.f32.mrf.mxu1  ;;  %1210 = vst.msk [vmem:[%s2091_s7 + $0x18] sm:$0xff] %vm1206_vm2, %v1193_v34  ;;  %v1192_v40 = vadd.f32 %v1121_v31, %v960_v35  ;;  %v963_v41 = vadd.f32 %v1650_v36, %v729_v32  ;;  %v739_v6 = vadd.f32 %v2078_v7, %v506_v26 }
 0x109   : > { %v899_v42 = vpop.f32.mrf.mxu0 }
 0x10a   : > { %v1131_v43 = vpop.f32.mrf.mxu1  ;;  %1209 = vst.msk [vmem:[%s2091_s7 + $0x10] sm:$0xff] %vm1206_vm2, %v1192_v40  ;;  %v1195_v46 = vadd.f32 %v1676_v37, %v963_v41  ;;  %v962_v47 = vadd.f32 %v899_v42, %v728_v38  ;;  %v738_v37 = vadd.f32 %v2083_v10, %v505_v30 }
 0x10b   : > { %v1653_v48 = vpop.f32.mrf.mxu0 }
 0x10c   : > { %v1679_v49 = vpop.f32.mrf.mxu1  ;;  %1212 = vst.msk [vmem:[%s2091_s7 + $0x28] sm:$0xff] %vm1206_vm2, %v1195_v46  ;;  %v1194_v52 = vadd.f32 %v1131_v43, %v962_v47  ;;  %v965_v54 = vadd.f32 %v1653_v48, %v731_v44 }
 0x10d   : > { %v909_v53 = vpop.f32.mrf.mxu0 }
 0x10e   : > { %v1141_v5 = vpop.f32.mrf.mxu1  ;;  %1211 = vst.msk [vmem:[%s2091_s7 + $0x20] sm:$0xff] %vm1206_vm2, %v1194_v52  ;;  %v1197_v11 = vadd.f32 %v1679_v49, %v965_v54  ;;  %v964_v55 = vadd.f32 %v909_v53, %v730_v50 }
 0x10f   : > { %v1656_v12 = vpop.f32.mrf.mxu0 }
 0x110   : > { %v1682_v13 = vpop.f32.mrf.mxu1  ;;  %1214 = vst.msk [vmem:[%s2091_s7 + $0x38] sm:$0xff] %vm1206_vm2, %v1197_v11  ;;  %v1196_v15 = vadd.f32 %v1141_v5, %v964_v55  ;;  %v967_v57 = vadd.f32 %v1656_v12, %v733_v56 }
 0x111   : > { %v919_v16 = vpop.f32.mrf.mxu0 }
 0x112   : > { %v1151_v17 = vpop.f32.mrf.mxu1  ;;  %1213 = vst.msk [vmem:[%s2091_s7 + $0x30] sm:$0xff] %vm1206_vm2, %v1196_v15  ;;  %v1199_v19 = vadd.f32 %v1682_v13, %v967_v57  ;;  %v966_v59 = vadd.f32 %v919_v16, %v732_v58 }
 0x113   : > { %v1659_v20 = vpop.f32.mrf.mxu0 }
 0x114   : > { %v1685_v21 = vpop.f32.mrf.mxu1  ;;  %1216 = vst.msk [vmem:[%s2091_s7 + $0x48] sm:$0xff] %vm1206_vm2, %v1199_v19  ;;  %v1198_v23 = vadd.f32 %v1151_v17, %v966_v59  ;;  %v969_v61 = vadd.f32 %v1659_v20, %v735_v60 }
 0x115   : > { %v929_v24 = vpop.f32.mrf.mxu0 }
 0x116   : > { %v1161_v25 = vpop.f32.mrf.mxu1  ;;  %1215 = vst.msk [vmem:[%s2091_s7 + $0x40] sm:$0xff] %vm1206_vm2, %v1198_v23  ;;  %v1201_v27 = vadd.f32 %v1685_v21, %v969_v61  ;;  %v968_v63 = vadd.f32 %v929_v24, %v734_v62 }
 0x117   : > { %v1662_v28 = vpop.f32.mrf.mxu0 }
 0x118   : > { %v1688_v29 = vpop.f32.mrf.mxu1  ;;  %1218 = vst.msk [vmem:[%s2091_s7 + $0x58] sm:$0xff] %vm1206_vm2, %v1201_v27  ;;  %v1200_v31 = vadd.f32 %v1161_v25, %v968_v63  ;;  %v971_v2 = vadd.f32 %v1662_v28, %v737_v1 }
 0x119   : > { %v939_v32 = vpop.f32.mrf.mxu0 }
 0x11a   : > { %v1171_v33 = vpop.f32.mrf.mxu1  ;;  %1217 = vst.msk [vmem:[%s2091_s7 + $0x50] sm:$0xff] %vm1206_vm2, %v1200_v31  ;;  %v1203_v34 = vadd.f32 %v1688_v29, %v971_v2  ;;  %v970_v35 = vadd.f32 %v939_v32, %v736_v3 }
 0x11b   : > { %v1665_v36 = vpop.f32.mrf.mxu0 }
 0x11c   : > { %v1691_v4 = vpop.f32.mrf.mxu1  ;;  %1220 = vst.msk [vmem:[%s2091_s7 + $0x68] sm:$0xff] %vm1206_vm2, %v1203_v34  ;;  %v1202_v0 = vadd.f32 %v1171_v33, %v970_v35  ;;  %v973_v9 = vadd.f32 %v1665_v36, %v739_v6 }
 0x11d   : > { %v949_v38 = vpop.f32.mrf.mxu0 }
 0x11e   : > { %1219 = vst.msk [vmem:[%s2091_s7 + $0x60] sm:$0xff] %vm1206_vm2, %v1202_v0  ;;  %v1205_v39 = vadd.f32 %v1691_v4, %v973_v9  ;;  %v972_v40 = vadd.f32 %v949_v38, %v738_v37  ;;  %v1181_v41 = vpop.f32.mrf.mxu1 }
 0x120   : > { %1222 = vst.msk [vmem:[%s2091_s7 + $0x78] sm:$0xff] %vm1206_vm2, %v1205_v39  ;;  %v1204_v7 = vadd.f32 %v1181_v41, %v972_v40 }
 0x122   : > { %1221 = vst.msk [vmem:[%s2091_s7 + $0x70] sm:$0xff] %vm1206_vm2, %v1204_v7 }
 0x123 PF: > { %s13_s20 = sadd.s32 1, %s1835_s20   ;;  %s2184_s12 = smov %s1819_s16 }
 0x124   : > { %p10_p11 = scmp.ge.s32.totalorder %s13_s20, 18   ;;  %s2185_s13 = smov %s1823_s17 }
 0x125   : > { %s2186_s14 = smov %s1827_s18  ;;  %s2187_s15 = smov %s1831_s19 }
 0x126   : > { %s2188_s16 = smov %s2193_s21  ;;  %s2189_s17 = smov %s2197_s22 }
 0x127   : > { %s2190_s18 = smov %s2201_s23  ;;  %s2191_s19 = smov %s2205_s24 }
 0x128   :  { %12 = sbr.rel (!%p10_p11) target bundleno = 5 (0x5), region = 72 }

</bundles_post_ra>
